<compile_context>
chip_gen: v7x
topology: tpu7x:2x2x1
jax: 0.10.0
libtpu: 0.0.40
codegen_flags: <defaults>
</compile_context>

<pallas_src>
import functools

import jax
import jax.numpy as jnp
from jax import lax
from jax.experimental import pallas as pl
from jax.experimental.pallas import tpu as pltpu


def _conv_ln_kernel(p_ref, w_ref, g_ref, b_ref, o_ref, *, eps, c2):
    # im2col patch tile (bm, K) bf16 @ weight (K, 2*dim) bf16 -> f32 accumulator
    acc = jnp.dot(p_ref[...], w_ref[...], preferred_element_type=jnp.float32)

    # LayerNorm over the output-channel (lane) dim: one-pass statistics
    # (sum and sum-of-squares together -> shorter reduce/broadcast dep chain).
    inv_n = jnp.float32(1.0 / c2)
    s1 = jnp.sum(acc, axis=-1, keepdims=True)
    s2 = jnp.sum(acc * acc, axis=-1, keepdims=True)
    mu = s1 * inv_n
    var = jnp.maximum(s2 * inv_n - mu * mu, jnp.float32(0.0))
    inv = lax.rsqrt(var + jnp.float32(eps))            # EUP, effectively free

    # gamma/beta already f32 (cast hoisted to the wrapper).
    y = (acc - mu) * inv * g_ref[...] + b_ref[...]
    o_ref[...] = y.astype(o_ref.dtype)


def _round_up(x, m):
    return (x + m - 1) // m * m


@functools.partial(jax.jit, static_argnames=("eps", "block_m"))
def conv_downsampler_forward(x, w, gamma, beta, *, eps=1e-5, block_m=None):
    """x: (B, H, W, dim) -> (B, ceil(H/2), ceil(W/2), 2*dim).

    w     : (3, 3, dim, 2*dim)  HWIO conv weight (== torch weight.permute(2,3,1,0))
    gamma : (2*dim,)            LayerNorm weight
    beta  : (2*dim,)            LayerNorm bias
    """
    B, H, W, C = x.shape
    KH, KW, C_in, C2 = w.shape
    assert (KH, KW, C_in) == (3, 3, C), "weight must be (3, 3, dim, 2*dim)"
    OH, OW = (H + 1) // 2, (W + 1) // 2

    # ---- im2col in XLA (fused pad + 9 strided slices + concat), bf16 operands ----
    cdt = jnp.bfloat16  # MXU-native feed; accumulation stays f32 in the kernel
    x_pad = jnp.pad(x.astype(cdt), ((0, 0), (1, 1), (1, 1), (0, 0)))
    taps = []
    for kh in range(3):
        for kw in range(3):
            taps.append(
                lax.slice(
                    x_pad,
                    (0, kh, kw, 0),
                    (B, kh + 2 * (OH - 1) + 1, kw + 2 * (OW - 1) + 1, C),
                    (1, 2, 2, 1),
                )
            )
    K = 9 * C
    patches = jnp.concatenate(taps, axis=-1).reshape(B * OH * OW, K)
    w2d = w.astype(cdt).reshape(K, C2)

    # Align the contraction dim to full 128-lane MXU passes when it is cheap
    # (<= 12.5% extra bytes); otherwise keep K as-is (still correct, just masked).
    k_aligned = _round_up(K, 128)
    if k_aligned != K and (k_aligned - K) * 8 <= K:
        patches = jnp.pad(patches, ((0, 0), (0, k_aligned - K)))
        w2d = jnp.pad(w2d, ((0, k_aligned - K), (0, 0)))
        K = k_aligned

    # Hoist the f32 casts / broadcasts of the LN affine params out of the kernel.
    g2d = gamma.astype(jnp.float32).reshape(1, C2)
    b2d = beta.astype(jnp.float32).reshape(1, C2)

    out_dt = x.dtype
    out_bytes = jnp.dtype(out_dt).itemsize

    # ---- generation-aware VMEM budget (v7x has 64 MiB, v5e/v6e have 128 MiB) ----
    try:
        vmem_phys = int(pltpu.get_tpu_info().vmem_capacity_bytes)
    except Exception:
        vmem_phys = 64 << 20               # v7x-safe fallback
    vmem_cap = (vmem_phys * 3) // 4        # leave headroom for compiler scratch

    # ---- M tiling: big lane-dense tiles, always >= 2 tiles for megacore ----
    M = B * OH * OW
    m_ceil = _round_up(M, 8)
    bm_target = block_m if block_m is not None else (
        1024 if vmem_cap > (80 << 20) else 512)
    bm = max(8, min(bm_target, m_ceil))
    if m_ceil // bm < 2 and m_ceil >= 16:
        bm = _round_up(-(-m_ceil // 2), 8)     # split into (at least) 2 tiles

    def _vmem_footprint(bm_):
        return (2 * bm_ * K * 2                # patch tile, bf16, double-buffered
                + 2 * bm_ * C2 * out_bytes     # output tile, double-buffered
                + K * C2 * 2                   # weight, VMEM resident (single)
                + 2 * C2 * 4                   # gamma / beta (f32)
                + 3 * bm_ * C2 * 4)            # f32 LN intermediates (acc/xc/y)

    while bm > 64 and _vmem_footprint(bm) + (2 << 20) > vmem_cap:
        bm = _round_up(bm // 2, 8)

    m_pad = _round_up(M, bm)
    if m_pad != M:
        # zero rows -> conv out 0 -> LN yields beta (finite); sliced off below
        patches = jnp.pad(patches, ((0, m_pad - M), (0, 0)))

    vmem_limit = int(min(vmem_cap, max(_vmem_footprint(bm) + (2 << 20), 32 << 20)))

    # Grid-invariant operands as whole-array VMEM residents (no double-buffering).
    _ms = getattr(pltpu, "MemorySpace", None) or getattr(pltpu, "TPUMemorySpace", None)
    if _ms is not None:
        w_spec = pl.BlockSpec(memory_space=_ms.VMEM)
        g_spec = pl.BlockSpec(memory_space=_ms.VMEM)
        b_spec = pl.BlockSpec(memory_space=_ms.VMEM)
    else:  # very old pallas: fall back to blocked constant-index specs
        w_spec = pl.BlockSpec((K, C2), lambda i: (0, 0))
        g_spec = pl.BlockSpec((1, C2), lambda i: (0, 0))
        b_spec = pl.BlockSpec((1, C2), lambda i: (0, 0))

    out2d = pl.pallas_call(
        functools.partial(_conv_ln_kernel, eps=eps, c2=C2),
        out_shape=jax.ShapeDtypeStruct((m_pad, C2), out_dt),
        grid_spec=pltpu.PrefetchScalarGridSpec(
            num_scalar_prefetch=0,
            grid=(m_pad // bm,),
            in_specs=[
                pl.BlockSpec((bm, K), lambda i: (i, 0)),   # im2col patch tile (bf16)
                w_spec,                                    # conv weight (bf16)
                g_spec,                                    # LN gamma (f32)
                b_spec,                                    # LN beta  (f32)
            ],
            out_specs=pl.BlockSpec((bm, C2), lambda i: (i, 0)),  # lane-dense out
        ),
        compiler_params=pltpu.CompilerParams(
            dimension_semantics=("parallel",),   # M tiles shard across TCs (v7x)
            vmem_limit_bytes=vmem_limit,
        ),
        cost_estimate=pl.CostEstimate(
            flops=2 * m_pad * K * C2 + 8 * m_pad * C2,
            transcendentals=m_pad,
            bytes_accessed=(m_pad * K * 2 + K * C2 * 2
                            + m_pad * C2 * out_bytes + 2 * C2 * 4),
        ),
    )(patches, w2d, g2d, b2d)

    if m_pad != M:
        out2d = out2d[:M]
    return out2d.reshape(B, OH, OW, C2)


def init_conv_downsampler_params(key, dim, dtype=jnp.float32):
    """Mimics PyTorch defaults: Conv2d kaiming-uniform-ish bound 1/sqrt(fan_in),
    LayerNorm weight=1, bias=0.  Conv weight stored in HWIO layout."""
    fan_in = dim * 3 * 3
    bound = 1.0 / (fan_in ** 0.5)
    w = jax.random.uniform(key, (3, 3, dim, 2 * dim), dtype, -bound, bound)
    gamma = jnp.ones((2 * dim,), dtype)
    beta = jnp.zeros((2 * dim,), dtype)
    return w, gamma, beta


def conv_downsampler_reference(x, w, gamma, beta, eps=1e-5):
    """Pure-JAX reference: NHWC conv (stride 2, pad 1, no bias) + LayerNorm."""
    y = lax.conv_general_dilated(
        x, w, window_strides=(2, 2), padding=((1, 1), (1, 1)),
        dimension_numbers=("NHWC", "HWIO", "NHWC"))
    mu = jnp.mean(y, axis=-1, keepdims=True)
    var = jnp.mean((y - mu) ** 2, axis=-1, keepdims=True)
    return (y - mu) / jnp.sqrt(var + eps) * gamma + beta


if __name__ == "__main__":
    key = jax.random.PRNGKey(0)
    kx, kp = jax.random.split(key)

    # Small shapes consistent with the module: (B, H, W, dim), dim doubled on out
    B, H, W, dim = 2, 16, 16, 32
    x = jax.random.normal(kx, (B, H, W, dim), dtype=jnp.float32)
    w, gamma, beta = init_conv_downsampler_params(kp, dim)

    out = conv_downsampler_forward(x, w, gamma, beta)
    out = jax.block_until_ready(out)
    assert out.shape == (B, (H + 1) // 2, (W + 1) // 2, 2 * dim)

    # Reference: same math in plain XLA, with the conv operands rounded to bf16
    # exactly like the kernel's MXU feed (accumulation is f32 in both paths).
    x_r = x.astype(jnp.bfloat16).astype(jnp.float32)
    w_r = w.astype(jnp.bfloat16).astype(jnp.float32)
    ref = conv_downsampler_reference(x_r, w_r, gamma, beta)
    assert jnp.allclose(out, ref, atol=5e-3, rtol=5e-3), \
        float(jnp.max(jnp.abs(out - ref)))

    print("KERNEL_OK")
</pallas_src>

<mosaic_0001>
module attributes {stable_mosaic.version = 11 : i64} {
  func.func @_conv_ln_kernel(%arg0: i32, %arg1: memref<64x288xbf16, #tpu.memory_space<vmem>>, %arg2: memref<288x64xbf16, #tpu.memory_space<vmem>>, %arg3: memref<1x64xf32, #tpu.memory_space<vmem>>, %arg4: memref<1x64xf32, #tpu.memory_space<vmem>>, %arg5: memref<64x64xf32, #tpu.memory_space<vmem>>) attributes {dimension_semantics = [#tpu.dimension_semantics<parallel>], iteration_bounds = array<i64: 2>, scalar_prefetch = 0 : i64, scratch_operands = 0 : i64, tpu.core_type = #tpu.core_type<tc>, window_params = [{transform_indices = @transform_0, window_bounds = array<i64: 64, 288>}, {pipeline_mode = #tpu.pipeline_mode<synchronous>, transform_indices = @transform_1, window_bounds = array<i64: 288, 64>}, {pipeline_mode = #tpu.pipeline_mode<synchronous>, transform_indices = @transform_2, window_bounds = array<i64: 1, 64>}, {pipeline_mode = #tpu.pipeline_mode<synchronous>, transform_indices = @transform_3, window_bounds = array<i64: 1, 64>}, {transform_indices = @transform_4, window_bounds = array<i64: 64, 64>}]} {
    %c0 = arith.constant 0 : index
    %c0_0 = arith.constant 0 : index
    %0 = vector.load %arg1[%c0, %c0_0] : memref<64x288xbf16, #tpu.memory_space<vmem>>, vector<64x288xbf16>
    %c0_1 = arith.constant 0 : index
    %c0_2 = arith.constant 0 : index
    %1 = vector.load %arg2[%c0_1, %c0_2] : memref<288x64xbf16, #tpu.memory_space<vmem>>, vector<288x64xbf16>
    %cst = arith.constant dense<0.000000e+00> : vector<64x64xf32>
    %2 = tpu.matmul %0, %1, %cst {dimension_numbers = #tpu.dot_dimension_numbers<[1], [0], [0], [1], [0, 0, 1, 1], [], []>} : vector<64x288xbf16>, vector<288x64xbf16>, vector<64x64xf32> -> vector<64x64xf32>
    %cst_3 = arith.constant dense<0.000000e+00> : vector<64xf32>
    %3 = vector.multi_reduction <add>, %2, %cst_3 [1] : vector<64x64xf32> to vector<64xf32>
    %4 = vector.shape_cast %3 : vector<64xf32> to vector<64x1xf32>
    %5 = arith.mulf %2, %2 : vector<64x64xf32>
    %cst_4 = arith.constant dense<0.000000e+00> : vector<64xf32>
    %6 = vector.multi_reduction <add>, %5, %cst_4 [1] : vector<64x64xf32> to vector<64xf32>
    %7 = vector.shape_cast %6 : vector<64xf32> to vector<64x1xf32>
    %cst_5 = arith.constant 1.562500e-02 : f32
    %8 = vector.broadcast %cst_5 : f32 to vector<64x1xf32>
    %9 = arith.mulf %4, %8 : vector<64x1xf32>
    %cst_6 = arith.constant 1.562500e-02 : f32
    %10 = vector.broadcast %cst_6 : f32 to vector<64x1xf32>
    %11 = arith.mulf %7, %10 : vector<64x1xf32>
    %12 = arith.mulf %9, %9 : vector<64x1xf32>
    %13 = arith.subf %11, %12 : vector<64x1xf32>
    %cst_7 = arith.constant 0.000000e+00 : f32
    %14 = vector.broadcast %cst_7 : f32 to vector<64x1xf32>
    %15 = arith.maximumf %13, %14 : vector<64x1xf32>
    %cst_8 = arith.constant 9.99999974E-6 : f32
    %16 = vector.broadcast %cst_8 : f32 to vector<64x1xf32>
    %17 = arith.addf %15, %16 : vector<64x1xf32>
    %18 = math.rsqrt %17 : vector<64x1xf32>
    %19 = vector.broadcast %9 : vector<64x1xf32> to vector<64x64xf32>
    %20 = arith.subf %2, %19 : vector<64x64xf32>
    %21 = vector.broadcast %18 : vector<64x1xf32> to vector<64x64xf32>
    %22 = arith.mulf %20, %21 : vector<64x64xf32>
    %c0_9 = arith.constant 0 : index
    %c0_10 = arith.constant 0 : index
    %23 = vector.load %arg3[%c0_9, %c0_10] : memref<1x64xf32, #tpu.memory_space<vmem>>, vector<1x64xf32>
    %24 = vector.broadcast %23 : vector<1x64xf32> to vector<64x64xf32>
    %25 = arith.mulf %22, %24 : vector<64x64xf32>
    %c0_11 = arith.constant 0 : index
    %c0_12 = arith.constant 0 : index
    %26 = vector.load %arg4[%c0_11, %c0_12] : memref<1x64xf32, #tpu.memory_space<vmem>>, vector<1x64xf32>
    %27 = vector.broadcast %26 : vector<1x64xf32> to vector<64x64xf32>
    %28 = arith.addf %25, %27 : vector<64x64xf32>
    %c0_13 = arith.constant 0 : index
    %c0_14 = arith.constant 0 : index
    %29 = vector.load %arg5[%c0_13, %c0_14] : memref<64x64xf32, #tpu.memory_space<vmem>>, vector<64x64xf32>
    tpu.vector_store %arg5[%c0_13, %c0_14], %28 {strides = array<i32>} : memref<64x64xf32, #tpu.memory_space<vmem>>, vector<64x64xf32>,
    return
  }
  func.func @transform_0(%arg0: i32) -> (i32, i32) {
    %c0_i32 = arith.constant 0 : i32
    %c0_i32_0 = arith.constant 0 : i32
    return %arg0, %c0_i32 : i32, i32
  }
  func.func @transform_1(%arg0: i32) -> (i32, i32) {
    %c0_i32 = arith.constant 0 : i32
    %c0_i32_0 = arith.constant 0 : i32
    %c0_i32_1 = arith.constant 0 : i32
    return %c0_i32, %c0_i32_0 : i32, i32
  }
  func.func @transform_2(%arg0: i32) -> (i32, i32) {
    %c0_i32 = arith.constant 0 : i32
    %c0_i32_0 = arith.constant 0 : i32
    %c0_i32_1 = arith.constant 0 : i32
    return %c0_i32, %c0_i32_0 : i32, i32
  }
  func.func @transform_3(%arg0: i32) -> (i32, i32) {
    %c0_i32 = arith.constant 0 : i32
    %c0_i32_0 = arith.constant 0 : i32
    %c0_i32_1 = arith.constant 0 : i32
    return %c0_i32, %c0_i32_0 : i32, i32
  }
  func.func @transform_4(%arg0: i32) -> (i32, i32) {
    %c0_i32 = arith.constant 0 : i32
    %c0_i32_0 = arith.constant 0 : i32
    return %arg0, %c0_i32 : i32, i32
  }
}

</mosaic_0001>

<bundles_post_ra>
// kernel: conv_downsampler_forward.1
= control target key start
LH: loop header
LB: loop body
LE: loop exit
PB: predicated region body
PF: predicated region fallthrough
CT: control target
= control target key end

     0   :  { %9 = vsyncpa [#allocation3], 0  ;;  %s1438_s0 = inlined_call_operand.vmem [shape: bf16[128,288], index: 0, kind: input, shape index: {}]   ;;  %s1439_s1 = inlined_call_operand.vmem [shape: bf16[288,64], index: 1, kind: input, shape index: {}]   ;;  %s1440_s2 = inlined_call_operand.vmem [shape: f32[1,64], index: 2, kind: input, shape index: {}]   ;;  %s1441_s3 = inlined_call_operand.vmem [shape: f32[1,64], index: 3, kind: input, shape index: {}]   ;;  %s1442_s4 = inlined_call_operand.hbm [shape: f32[128,64], index: 4, kind: output, shape index: {}]  }
   0x1   :  { %11 = vsyncpa [#allocation3 + $0x1], 0  ;;  %s1116_s15 = smov 0   ;;  %s1118_s16 = smov 0  }
   0x2   :  { %s1120_s17 = smov 0   ;;  %s1122_s18 = smov 0  }
   0x3 LB: > { %s1137_s19 = sadd.s32 4294967295, %s1086_s18   ;;  %s809_s20 = sadd.s32 4294967294, %s1086_s18   ;;  %s1086_s18 = sphi %s1122_s18, %s1448_s18   ;;  %s1082_s17 = sphi %s1120_s17, %s1447_s17   ;;  %s1078_s16 = sphi %s1118_s16, %s1446_s16   ;;  %s1074_s15 = sphi %s1116_s15, %s1445_s15  }
   0x4   : > { %s1141_s21 = sadd.s32 1, %s1086_s18   ;;  %s113_s22 = sadd.s32 1, %s1082_s17 }
   0x5   : > { %s110_s23 = ssub.s32 %s1086_s18, %s1141_s21  ;;  %p123_p0 = scmp.ne.s32.totalorder %s1082_s17, %s1078_s16 }
   0x6   : > { %p111_p1 = scmp.eq.s32.totalorder %s110_s23, 0  ;;  %p124_p2 = scmp.eq.s32.totalorder %s1137_s19, 1 }
   0x7   : > { %p129_p3 = scmp.ne.s32.totalorder %s1078_s16, %s1074_s15  ;;  %p130_p4 = scmp.eq.s32.totalorder %s809_s20, 1 }
   0x8   : > { %s1152_s24 = scalar_select %p111_p1, %s1082_s17, %s113_s22  }
   0x9   : > { %p1154_p5 = por %p124_p2, %p123_p0  ;;  %p1158_p6 = por %p130_p4, %p129_p3 }
   0xa   : > { %p812_p7 = scmp.ge.s32.totalorder %s1086_s18, 1  ;;  %p167_p8 = scmp.lt.s32.totalorder %s1086_s18, 3 }
   0xc   : > { %p168_p9 = pnand %p812_p7, %p167_p8 }
   0xd   : > { %v974_v0 = vld [vmem:[%s1439_s1 + $0x40] sm:$0xff] (!%p168_p9)   ;;  %s814_s29 = sshll.u32 (!%p168_p9), %s1137_s19, 3  ;;  %v976_v2 = vld [vmem:[%s1439_s1 + $0x48] sm:$0xff] (!%p168_p9)   ;;  %v978_v4 = vld [vmem:[%s1439_s1 + $0x50] sm:$0xff] (!%p168_p9)   ;;  %vm423_vm0 = vcmask (!%p168_p9), 261120   ;;  %vm566_vm1 = vcmask (!%p168_p9), 523264  }
   0xe   : > { %171 = sbr.rel (%p168_p9) target bundleno = 482 (0x1e2), region = 36  ;;  %v975_v1 = vld [vmem:[%s1439_s1] sm:$0xff] (!%p168_p9)   ;;  %858 = vmatprep.subr.bf16.mxu0 (!%p168_p9), %v974_v0  ;;  %916 = vmatprep.subr.bf16.mxu1 (!%p168_p9), %v974_v0  ;;  %p195_p10 = scmp.lt.s32.totalorder (!%p168_p9), %s814_s29, 15  ;;  %v977_v3 = vld [vmem:[%s1439_s1 + $0x8] sm:$0xff] (!%p168_p9)   ;;  %v979_v5 = vld [vmem:[%s1439_s1 + $0x10] sm:$0xff] (!%p168_p9)  }
   0xf   : > { %859 = vmatpush3.bf16.msra.mxu0 (!%p168_p9), %v975_v1  ;;  %924 = vmatpush3.bf16.msra.mxu1 (!%p168_p9), %v975_v1  ;;  %v980_v6 = vld [vmem:[%s1439_s1 + $0x58] sm:$0xff] (!%p168_p9)   ;;  %v982_v8 = vld [vmem:[%s1439_s1 + $0x60] sm:$0xff] (!%p168_p9)   ;;  %v984_v10 = vld [vmem:[%s1439_s1 + $0x68] sm:$0xff] (!%p168_p9)   ;;  %s857_s20 = sshll.u32 (!%p168_p9), %s1137_s19, 10  ;;  %s1088_s5 = smov (!%p168_p9), [#allocation2]  }
  0x10   : > { %860 = vmatprep.subr.bf16.mxu0 (!%p168_p9), %v976_v2  ;;  %917 = vmatprep.subr.bf16.mxu1 (!%p168_p9), %v976_v2  ;;  %v981_v7 = vld [vmem:[%s1439_s1 + $0x18] sm:$0xff] (!%p168_p9)   ;;  %v983_v9 = vld [vmem:[%s1439_s1 + $0x20] sm:$0xff] (!%p168_p9)   ;;  %v985_v13 = vld [vmem:[%s1439_s1 + $0x28] sm:$0xff] (!%p168_p9)   ;;  %s1386_s28 = scalar_lea.hbm (!%p168_p9), %s1442_s4, %s857_s20  ;;  %s1028_s6 = sshll.u32 (!%p168_p9), %s1088_s5, 4  ;;  %s1029_s6 = int_to_ptr.vmem [resolvable:$false] %s1028_s6 }
  0x11   : > { %v986_v14 = vld [vmem:[%s1439_s1 + $0x70] sm:$0xff] (!%p168_p9)   ;;  %v988_v16 = vld [vmem:[%s1439_s1 + $0x78] sm:$0xff] (!%p168_p9)   ;;  %v996_v18 = vld [vmem:[%s1439_s1 + $0x80] sm:$0xff] (!%p168_p9)  }
  0x12   : > { %v987_v15 = vld [vmem:[%s1439_s1 + $0x30] sm:$0xff] (!%p168_p9)   ;;  %v989_v17 = vld [vmem:[%s1439_s1 + $0x38] sm:$0xff] (!%p168_p9)   ;;  %v997_v22 = vld [vmem:[%s1439_s1 + $0x88] sm:$0xff] (!%p168_p9)  }
  0x13   : > { %861 = vmatpush3.bf16.msra.mxu0 (!%p168_p9), %v977_v3  ;;  %925 = vmatpush3.bf16.msra.mxu1 (!%p168_p9), %v977_v3 }
  0x14   : > { %862 = vmatprep.subr.bf16.mxu0 (!%p168_p9), %v978_v4  ;;  %918 = vmatprep.subr.bf16.mxu1 (!%p168_p9), %v978_v4 }
  0x15   : > { %s1450_s29 = smov (!%p195_p10, %s814_s29), 15 }
  0x16   : > { %s932_s22 = smul.u32 12, %s1450_s29  ;;  %s1030_s29 = scalar_lea.vmem %s1029_s6, 2048 }
  0x17   : > { %863 = vmatpush3.bf16.msra.mxu0 %v979_v5  ;;  %926 = vmatpush3.bf16.msra.mxu1 %v979_v5 }
  0x18   : > { %864 = vmatprep.subr.bf16.mxu0 %v980_v6  ;;  %919 = vmatprep.subr.bf16.mxu1 %v980_v6  ;;  %s1195_s7 = scalar_lea.vmem %s1438_s0, %s932_s22 }
  0x19   : > { %v992_v11 = vld [vmem:[%s1195_s7 + $0x4] ss:$12 sps:$4 sm:$0xff]   ;;  %v995_v12 = vld [vmem:[%s1195_s7 + $0x4c] ss:$12 sps:$4 sm:$0xff]   ;;  %v993_v20 = vld [vmem:[%s1195_s7 + $0x48] ss:$12 sps:$4 sm:$0xff]  }
  0x1a   : > { %468 = vmatprep.mubr.bf16.mxu0 %v992_v11  ;;  %492 = vmatprep.mubr.bf16.mxu1 %v995_v12  ;;  %v990_v19 = vld [vmem:[%s1195_s7] ss:$12 sps:$4 sm:$0xff]   ;;  %v998_v21 = vld [vmem:[%s1195_s7 + $0x1c] ss:$12 sps:$4 sm:$0xff]   ;;  %v1001_v24 = vld [vmem:[%s1195_s7 + $0x18] ss:$12 sps:$4 sm:$0xff]  }
  0x1b   : > { %865 = vmatpush3.bf16.msra.mxu0 %v981_v7  ;;  %927 = vmatpush3.bf16.msra.mxu1 %v981_v7  ;;  %v1000_v23 = vld [vmem:[%s1195_s7 + $0x8] ss:$12 sps:$4 sm:$0xff]   ;;  %v1002_v25 = vld [vmem:[%s1195_s7 + $0x20] ss:$12 sps:$4 sm:$0xff]   ;;  %v1003_v26 = vld [vmem:[%s1195_s7 + $0x38] ss:$12 sps:$4 sm:$0xff]  }
  0x1c   : > { %866 = vmatprep.subr.bf16.mxu0 %v982_v8  ;;  %920 = vmatprep.subr.bf16.mxu1 %v982_v8  ;;  %v1005_v27 = vld [vmem:[%s1195_s7 + $0x34] ss:$12 sps:$4 sm:$0xff]   ;;  %v1004_v28 = vld [vmem:[%s1195_s7 + $0x50] ss:$12 sps:$4 sm:$0xff]  }
  0x1d   : > { %v1007_v29 = vld [vmem:[%s1195_s7 + $0x30] ss:$12 sps:$4 sm:$0xff]   ;;  %s191_s7 = sand.u32 1, %s1078_s16  }
  0x1e   : > { %s813_s11 = sshll.u32 %s191_s7, 6  ;;  %s1397_s19 = scalar_lea.sflag [#allocation3], %s191_s7 }
  0x1f   : > { %867 = vmatpush3.bf16.msra.mxu0 %v983_v9  ;;  %928 = vmatpush3.bf16.msra.mxu1 %v983_v9  ;;  %s1347_s14 = scalar_lea.vmem [#allocation2], %s813_s11 }
  0x20   : > { %868 = vmatprep.subr.bf16.mxu0 %v984_v10  ;;  %921 = vmatprep.subr.bf16.mxu1 %v984_v10  ;;  %s747_s22 = sshll.u32 %s1347_s14, 4  ;;  %s1388_s22 = int_to_ptr.vmem [resolvable:$true] %s747_s22 }
  0x21   : > { %s1024_s30 = scalar_lea.vmem %s1388_s22, 1024  ;;  %p1031_p0 = scmp.lt.s32.totalorder %s1388_s22, %s1029_s6 }
  0x22   : > { %p1025_p11 = scmp.ne.s32.totalorder %s1388_s22, %s1024_s30  ;;  %p1032_p1 = scmp.lt.s32.totalorder %s1030_s29, %s1024_s30 }
  0x23   : > { %869 = vmatpush3.bf16.msra.mxu0 %v985_v13  ;;  %929 = vmatpush3.bf16.msra.mxu1 %v985_v13 }
  0x24   : > { %870 = vmatprep.subr.bf16.mxu0 %v986_v14  ;;  %922 = vmatprep.subr.bf16.mxu1 %v986_v14  ;;  %p1026_p12 = pnand %p1025_p11, %p1154_p5  ;;  %p1033_p2 = por %p1032_p1, %p1031_p0 }
  0x26   : > { %p1027_p13 = pneg %p1026_p12 }
  0x27   : > { %871 = vmatpush3.bf16.msra.mxu0 %v987_v15  ;;  %930 = vmatpush3.bf16.msra.mxu1 %v987_v15 }
  0x28   : > { %872 = vmatprep.subr.bf16.mxu0 %v988_v16  ;;  %923 = vmatprep.subr.bf16.mxu1 %v988_v16  ;;  %p1034_p3 = pnand %p1033_p2, %p1027_p13 }
  0x2b   : > { %873 = vmatpush3.bf16.msra.mxu0 %v989_v17  ;;  %931 = vmatpush3.bf16.msra.mxu1 %v989_v17 }
  0x2c   : > { %904 = vmatprep.subr.bf16.mxu1 %v996_v18 }
  0x2e   : > { %469 = vmatmul.mubr.bf16.vlgmr.msra.gmra.mrb[0].mxu0 %v990_v19  ;;  %493 = vmatmul.mubr.bf16.vlgmr.msra.gmra.mrb[0].mxu1 %v993_v20 }
  0x2f   : > { %905 = vmatpush3.bf16.msra.mxu1 %v996_v18  ;;  %476 = vmatprep.mubr.bf16.mxu0 %v998_v21 }
  0x30   : > { %906 = vmatprep.subr.bf16.mxu1 %v997_v22  ;;  %908 = vmatprep.mubr.msk.bf16.mxu1 %vm423_vm0, %v1000_v23 }
  0x33   : > { %907 = vmatpush3.bf16.msra.mxu1 %v997_v22 }
  0x36   : > { %477 = vmatmul.mubr.bf16.gmra.mrb[4].mxu0 %v1001_v24  ;;  %909 = vmatmul.mubr.msk.bf16.vlgmr.msra.gmra.mrb[4].mxu1 %vm423_vm0, %v1002_v25 }
  0x37   : > { %912 = vmatprep.mubr.msk.bf16.mxu1 %vm423_vm0, %v1003_v26  ;;  %484 = vmatprep.mubr.bf16.mxu0 %v1005_v27 }
  0x3e   : > { %913 = vmatmul.mubr.msk.bf16.gmra.mrb[8].mxu1 %vm423_vm0, %v1004_v28  ;;  %485 = vmatmul.mubr.bf16.gmra.mrb[8].mxu0 %v1007_v29 }
 0x101   : > { %v874_v30 = vpop.f32.mrb[0].mxu0  ;;  %v892_v31 = vpop.f32.mrb[0].mxu1 }
 0x102   : > { %v875_v32 = vpop.f32.mrb[1].mxu0  ;;  %v893_v33 = vpop.f32.mrb[1].mxu1 }
 0x103   : > { %v876_v34 = vadd.f32 %v875_v32, %v874_v30  ;;  %v894_v35 = vadd.f32 %v893_v33, %v892_v31  ;;  %v877_v36 = vpop.f32.mrb[2].mxu0  ;;  %v895_v37 = vpop.f32.mrb[2].mxu1 }
 0x104   : > { %v878_v38 = vpop.f32.mrb[3].mxu0  ;;  %v896_v39 = vpop.f32.mrb[3].mxu1 }
 0x105   : > { %v879_v40 = vadd.f32 %v878_v38, %v877_v36  ;;  %v897_v41 = vadd.f32 %v896_v39, %v895_v37 }
 0x109   : > { %v880_v42 = vpop.f32.mrb[4].mxu0  ;;  %v910_v43 = vpop.f32.mrb[4].mxu1 }
 0x10a   : > { %v881_v44 = vpop.f32.mrb[5].mxu0  ;;  %v535_v45 = vpop.f32.mrb[5].mxu1 }
 0x10b   : > { %v882_v46 = vadd.f32 %v881_v44, %v880_v42  ;;  %v1240_v47 = vadd.f32 %v876_v34, %v535_v45  ;;  %v883_v48 = vpop.f32.mrb[6].mxu0  ;;  %v911_v49 = vpop.f32.mrb[6].mxu1 }
 0x10c   : > { %v884_v50 = vpop.f32.mrb[7].mxu0  ;;  %v538_v51 = vpop.f32.mrb[7].mxu1 }
 0x10d   : > { %v1242_v52 = vadd.f32 %v910_v43, %v882_v46  ;;  %v885_v53 = vadd.f32 %v884_v50, %v883_v48  ;;  %v1244_v54 = vadd.f32 %v879_v40, %v538_v51  ;;  %v567_v55 = vsel %vm566_vm1, %v1240_v47, 0.0 }
 0x10e   : > { %568 = vadd.xlane.f32.xlu0 %v567_v55  ;;  %v591_v61 = vmul.f32 %v1240_v47, %v1240_v47 }
 0x10f   : > { %v1248_v56 = vadd.f32 %v911_v49, %v885_v53  ;;  %v573_v57 = vsel %vm566_vm1, %v1242_v52, 0.0  ;;  %v570_v59 = vsel %vm566_vm1, %v1244_v54, 0.0  ;;  %v592_v5 = vmul.f32 %v1244_v54, %v1244_v54 }
 0x110   : > { %574 = vadd.xlane.f32.xlu1 %v573_v57  ;;  %v599_v10 = vsel %vm566_vm1, %v591_v61, 0.0  ;;  %v593_v12 = vmul.f32 %v1242_v52, %v1242_v52 }
 0x111   : > { %v914_v58 = vpop.f32.mrb[8].mxu1  ;;  %v886_v60 = vpop.f32.mrb[8].mxu0  ;;  %v576_v2 = vsel %vm566_vm1, %v1248_v56, 0.0  ;;  %v602_v13 = vsel %vm566_vm1, %v592_v5, 0.0  ;;  %v594_v15 = vmul.f32 %v1248_v56, %v1248_v56 }
 0x112   : > { %v1256_v62 = vadd.f32 %v914_v58, %v894_v35  ;;  %v551_v63 = vpop.f32.mrb[9].mxu1  ;;  %571 = vadd.xlane.f32.xlu0 %v570_v59  ;;  %v887_v0 = vpop.f32.mrb[9].mxu0  ;;  %v605_v16 = vsel %vm566_vm1, %v593_v12, 0.0 }
 0x113   : > { %v915_v1 = vpop.f32.mrb[10].mxu1  ;;  %v888_v3 = vadd.f32 %v887_v0, %v886_v60  ;;  %v889_v4 = vpop.f32.mrb[10].mxu0  ;;  %v608_v17 = vsel %vm566_vm1, %v594_v15, 0.0 }
 0x114   : > { %v1262_v6 = vadd.f32 %v915_v1, %v897_v41  ;;  %577 = vadd.xlane.f32.xlu1 %v576_v2  ;;  %v890_v7 = vpop.f32.mrb[11].mxu0  ;;  %v554_v8 = vpop.f32.mrb[11].mxu1  ;;  %v585_v18 = vsel %vm566_vm1, %v1256_v62, 0.0  ;;  %v597_v25 = vmul.f32 %v1256_v62, %v1256_v62 }
 0x115   : > { %v1264_v9 = vadd.f32 %v888_v3, %v551_v63  ;;  %v891_v11 = vadd.f32 %v890_v7, %v889_v4 }
 0x116   : > { %600 = vadd.xlane.f32.xlu0 %v599_v10  ;;  %v588_v19 = vsel %vm566_vm1, %v1262_v6, 0.0  ;;  %v598_v27 = vmul.f32 %v1262_v6, %v1262_v6  ;;  %v617_v28 = vsel %vm566_vm1, %v597_v25, 0.0 }
 0x117   : > { %v1270_v14 = vadd.f32 %v891_v11, %v554_v8  ;;  %v579_v20 = vsel %vm566_vm1, %v1264_v9, 0.0  ;;  %v595_v21 = vmul.f32 %v1264_v9, %v1264_v9 }
 0x118   : > { %603 = vadd.xlane.f32.xlu1 %v602_v13  ;;  %v620_v29 = vsel %vm566_vm1, %v598_v27, 0.0  ;;  %v1334_v27 = vld [vmem:[%s1441_s3] ss:$0 sm:$0xff] }
 0x119   : > { %v582_v22 = vsel %vm566_vm1, %v1270_v14, 0.0  ;;  %v596_v23 = vmul.f32 %v1270_v14, %v1270_v14  ;;  %v611_v24 = vsel %vm566_vm1, %v595_v21, 0.0 }
 0x11a   : > { %606 = vadd.xlane.f32.xlu0 %v605_v16 }
 0x11b   : > { %v614_v26 = vsel %vm566_vm1, %v596_v23, 0.0 }
 0x11c   : > { %609 = vadd.xlane.f32.xlu1 %v608_v17 }
 0x11e   : > { %586 = vadd.xlane.f32.xlu0 %v585_v18 }
 0x120   : > { %589 = vadd.xlane.f32.xlu1 %v588_v19 }
 0x122   : > { %580 = vadd.xlane.f32.xlu0 %v579_v20  ;;  %v1323_v20 = vld [vmem:[%s1440_s2] ss:$0 sm:$0xff] }
 0x124   : > { %583 = vadd.xlane.f32.xlu1 %v582_v22 }
 0x126   : > { %612 = vadd.xlane.f32.xlu0 %v611_v24 }
 0x128   : > { %615 = vadd.xlane.f32.xlu1 %v614_v26 }
 0x12a   : > { %618 = vadd.xlane.f32.xlu0 %v617_v28 }
 0x12c   : > { %621 = vadd.xlane.f32.xlu1 %v620_v29 }
 0x19b   : > { %v569_v30 = vpop.xlane.xlu0 %568 }
 0x19c   : > { %v623_v33 = vmul.f32 0.015625, %v569_v30 }
 0x19d   : > { %v575_v31 = vpop.xlane.xlu1 %574 }
 0x19e   : > { %v639_v37 = vmul.f32 %v623_v33, %v623_v33  ;;  %v1298_v38 = vmul.f32 0.015625, %v575_v31  ;;  %v679_v16 = vsub.f32 %v1240_v47, %v623_v33 }
 0x19f   : > { %v572_v32 = vpop.xlane.xlu0 %571 }
 0x1a0   : > { %v1296_v35 = vmul.f32 0.015625, %v572_v32  ;;  %v641_v46 = vmul.f32 %v1298_v38, %v1298_v38  ;;  %v681_v32 = vsub.f32 %v1242_v52, %v1298_v38 }
 0x1a1   : > { %v578_v34 = vpop.xlane.xlu1 %577 }
 0x1a2   : > { %v1300_v40 = vmul.f32 0.015625, %v578_v34  ;;  %v640_v42 = vmul.f32 %v1296_v35, %v1296_v35  ;;  %v680_v24 = vsub.f32 %v1244_v54, %v1296_v35 }
 0x1a3   : > { %v601_v36 = vpop.xlane.xlu0 %600 }
 0x1a4   : > { %v631_v39 = vmul.f32 0.015625, %v601_v36  ;;  %v642_v51 = vmul.f32 %v1300_v40, %v1300_v40 }
 0x1a5   : > { %v604_v41 = vpop.xlane.xlu1 %603 }
 0x1a6   : > { %v647_v43 = vsub.f32 %v631_v39, %v639_v37  ;;  %v632_v44 = vmul.f32 0.015625, %v604_v41 }
 0x1a7   : > { %v607_v45 = vpop.xlane.xlu0 %606 }
 0x1a8   : > { %v655_v48 = vmax.f32 %v647_v43, 0.0  ;;  %v648_v49 = vsub.f32 %v632_v44, %v640_v42  ;;  %v633_v50 = vmul.f32 0.015625, %v607_v45  ;;  %v682_v43 = vsub.f32 %v1248_v56, %v1300_v40 }
 0x1a9   : > { %v610_v53 = vpop.xlane.xlu1 %609 }
 0x1aa   : > { %v663_v55 = vadd.f32 1e-05, %v655_v48  ;;  %v656_v57 = vmax.f32 %v648_v49, 0.0  ;;  %v649_v58 = vsub.f32 %v633_v50, %v641_v46  ;;  %v634_v59 = vmul.f32 0.015625, %v610_v53 }
 0x1ab   : > { %v587_v60 = vpop.xlane.xlu0 %586 }
 0x1ac   : > { %1008 = vrsqrt.f32 %v663_v55  ;;  %v664_v61 = vadd.f32 1e-05, %v656_v57  ;;  %v657_v63 = vmax.f32 %v649_v58, 0.0  ;;  %v650_v0 = vsub.f32 %v634_v59, %v642_v51 }
 0x1ad   : > { %v590_v1 = vpop.xlane.xlu1 %589  ;;  %v1313_v12 = vmul.f32 0.015625, %v587_v60 }
 0x1ae   : > { %1010 = vrsqrt.f32 %v664_v61  ;;  %v665_v2 = vadd.f32 1e-05, %v657_v63  ;;  %v658_v3 = vmax.f32 %v650_v0, 0.0  ;;  %v1318_v17 = vmul.f32 0.015625, %v590_v1 }
 0x1af   : > { %v581_v4 = vpop.xlane.xlu0 %580  ;;  %v645_v28 = vmul.f32 %v1313_v12, %v1313_v12 }
 0x1b0   : > { %1012 = vrsqrt.f32 %v665_v2  ;;  %v666_v5 = vadd.f32 1e-05, %v658_v3  ;;  %v1308_v7 = vmul.f32 0.015625, %v581_v4  ;;  %v646_v34 = vmul.f32 %v1318_v17, %v1318_v17 }
 0x1b1   : > { %v584_v8 = vpop.xlane.xlu1 %583  ;;  %v685_v2 = vsub.f32 %v1256_v62, %v1313_v12 }
 0x1b2   : > { %1014 = vrsqrt.f32 %v666_v5  ;;  %v1310_v10 = vmul.f32 0.015625, %v584_v8  ;;  %v643_v13 = vmul.f32 %v1308_v7, %v1308_v7  ;;  %v683_v60 = vsub.f32 %v1264_v9, %v1308_v7 }
 0x1b3   : > { %v613_v11 = vpop.xlane.xlu0 %612  ;;  %v686_v8 = vsub.f32 %v1262_v6, %v1318_v17 }
 0x1b4   : > { %v635_v15 = vmul.f32 0.015625, %v613_v11  ;;  %v644_v21 = vmul.f32 %v1310_v10, %v1310_v10  ;;  %v684_v63 = vsub.f32 %v1270_v14, %v1310_v10 }
 0x1b5   : > { %v616_v18 = vpop.xlane.xlu1 %615 }
 0x1b6   : > { %v1009_v19 = vpop.eup %1008  ;;  %v651_v22 = vsub.f32 %v635_v15, %v643_v13  ;;  %v636_v23 = vmul.f32 0.015625, %v616_v18 }
 0x1b7   : > { %v687_v47 = vmul.f32 %v1009_v19, %v679_v16  ;;  %v619_v25 = vpop.xlane.xlu0 %618 }
 0x1b8   : > { %v1011_v26 = vpop.eup %1010  ;;  %v659_v29 = vmax.f32 %v651_v22, 0.0  ;;  %v652_v30 = vsub.f32 %v636_v23, %v644_v21  ;;  %v637_v31 = vmul.f32 0.015625, %v619_v25 }
 0x1b9   : > { %v702_v54 = vmul.f32 %v1323_v20, %v687_v47  ;;  %v688_v33 = vmul.f32 %v1011_v26, %v680_v24  ;;  %v622_v35 = vpop.xlane.xlu1 %621 }
 0x1ba   : > { %v1013_v36 = vpop.eup %1012  ;;  %v667_v37 = vadd.f32 1e-05, %v659_v29  ;;  %v660_v39 = vmax.f32 %v652_v30, 0.0  ;;  %v653_v41 = vsub.f32 %v637_v31, %v645_v28  ;;  %v638_v42 = vmul.f32 0.015625, %v622_v35 }
 0x1bb   : > { %v717_v44 = vadd.f32 %v1334_v27, %v702_v54  ;;  %v703_v45 = vmul.f32 %v1323_v20, %v688_v33  ;;  %v689_v52 = vmul.f32 %v1013_v36, %v681_v32 }
 0x1bc   : > { %v1015_v38 = vpop.eup %1014  ;;  %1016 = vrsqrt.f32 %v667_v37  ;;  %v668_v46 = vadd.f32 1e-05, %v660_v39  ;;  %v661_v48 = vmax.f32 %v653_v41, 0.0  ;;  %v654_v49 = vsub.f32 %v638_v42, %v646_v34 }
 0x1bd   : > { %725 = vst.msk [vmem:[%s1347_s14] sm:$0xff] %vm566_vm1, %v717_v44  ;;  %v718_v56 = vadd.f32 %v1334_v27, %v703_v45  ;;  %v704_v40 = vmul.f32 %v1323_v20, %v689_v52  ;;  %v690_v50 = vmul.f32 %v1015_v38, %v682_v43 }
 0x1be   : > { %1018 = vrsqrt.f32 %v668_v46  ;;  %v669_v51 = vadd.f32 1e-05, %v661_v48  ;;  %v662_v53 = vmax.f32 %v654_v49, 0.0 }
 0x1bf   : > { %726 = vst.msk [vmem:[%s1347_s14 + $0x8] sm:$0xff] %vm566_vm1, %v718_v56  ;;  %v719_v55 = vadd.f32 %v1334_v27, %v704_v40  ;;  %v705_v57 = vmul.f32 %v1323_v20, %v690_v50 }
 0x1c0   : > { %1020 = vrsqrt.f32 %v669_v51  ;;  %v670_v58 = vadd.f32 1e-05, %v662_v53 }
 0x1c1   : > { %727 = vst.msk [vmem:[%s1347_s14 + $0x10] sm:$0xff] %vm566_vm1, %v719_v55  ;;  %v720_v59 = vadd.f32 %v1334_v27, %v705_v57 }
 0x1c2   : > { %1022 = vrsqrt.f32 %v670_v58 }
 0x1c3   : > { %728 = vst.msk [vmem:[%s1347_s14 + $0x18] sm:$0xff] %vm566_vm1, %v720_v59 }
 0x1c6   : > { %v1017_v61 = vpop.eup %1016 }
 0x1c7   : > { %v691_v0 = vmul.f32 %v1017_v61, %v683_v60 }
 0x1c8   : > { %v1019_v1 = vpop.eup %1018 }
 0x1c9   : > { %v706_v3 = vmul.f32 %v1323_v20, %v691_v0  ;;  %v692_v4 = vmul.f32 %v1019_v1, %v684_v63 }
 0x1ca   : > { %v1021_v5 = vpop.eup %1020 }
 0x1cb   : > { %v721_v9 = vadd.f32 %v1334_v27, %v706_v3  ;;  %v707_v14 = vmul.f32 %v1323_v20, %v692_v4  ;;  %v693_v7 = vmul.f32 %v1021_v5, %v685_v2 }
 0x1cc   : > { %v1023_v10 = vpop.eup %1022 }
 0x1cd   : > { %729 = vst.msk [vmem:[%s1347_s14 + $0x20] sm:$0xff] %vm566_vm1, %v721_v9  ;;  %v722_v62 = vadd.f32 %v1334_v27, %v707_v14  ;;  %v708_v11 = vmul.f32 %v1323_v20, %v693_v7  ;;  %v694_v12 = vmul.f32 %v1023_v10, %v686_v8 }
 0x1cf   : > { %730 = vst.msk [vmem:[%s1347_s14 + $0x28] sm:$0xff] %vm566_vm1, %v722_v62  ;;  %v723_v6 = vadd.f32 %v1334_v27, %v708_v11  ;;  %v709_v13 = vmul.f32 %v1323_v20, %v694_v12 }
 0x1d1   : > { %731 = vst.msk [vmem:[%s1347_s14 + $0x30] sm:$0xff] %vm566_vm1, %v723_v6  ;;  %v724_v15 = vadd.f32 %v1334_v27, %v709_v13 }
 0x1d3   : > { %732 = vst.msk [vmem:[%s1347_s14 + $0x38] sm:$0xff] %vm566_vm1, %v724_v15 }
 0x1d4   : > { %1037 = shalt.err (!%p1034_p3)
}
 0x1d5   : > { %s1038_s8 = scalar_lea.hbm %s1386_s28, 1024  ;;  %s1042_s10 = scalar_lea.hbm %s1442_s4, 2048 }
 0x1d6   : > { %p1039_p4 = scmp.ne.s32.totalorder %s1386_s28, %s1038_s8  ;;  %p1043_p9 = scmp.lt.u32.totalorder %s1386_s28, %s1442_s4 }
 0x1d7   : > { %p1044_p10 = scmp.lt.u32.totalorder %s1042_s10, %s1038_s8  ;;  %p1046_p12 = scmp.lt.u32.totalorder %s1038_s8, %s1386_s28 }
 0x1d8   : > { %p1040_p7 = pnand %p1039_p4, %p1154_p5 }
 0x1d9   : > { %p1045_p11 = por %p1044_p10, %p1043_p9 }
 0x1da   : > { %p1041_p8 = pneg %p1040_p7 }
 0x1db   : > { %p1047_p13 = por %p1046_p12, %p1045_p11 }
 0x1dd   : > { %p1048_p0 = pnand %p1047_p13, %p1041_p8 }
 0x1df   : > { %1051 = shalt.err (!%p1048_p0)
}
 0x1e0   : > { %s1089_s13 = smov 128   ;;  %s1090_s14 = smov 8  }
 0x1e1   : > { %933 = dma.vmem_to_hbm [thread:$0]  (%p1154_p5), %s1388_s22, 1024, %s1386_s28, %s1397_s19, %s1089_s13, %s1089_s13, %s1090_s14  }
 0x1e2 PF: > { %p939_p1 = scmp.ge.s32.totalorder %s1086_s18, 2  ;;  %s762_s20 = sand.u32 1, %s1074_s15  }
 0x1e3   : > { %s763_s23 = scalar_lea.sflag [#allocation3], %s762_s20 }
 0x1e4   : > { %p936_p2 = pnand %p939_p1, %p1158_p6 }
 0x1e6   : > { %1069 = dma.done.wait (!%p936_p2), %s763_s23, 1024  }
 0x1e7   : > { %1071 = vsyncadd (!%p936_p2), %s763_s23, 4294966272  ;;  %p14_p3 = scmp.ge.s32.totalorder %s1141_s21, 4   ;;  %s1445_s15 = smov %s1078_s16 }
 0x1e8   : > { %s1446_s16 = smov %s1082_s17  ;;  %s1447_s17 = smov %s1152_s24 }
 0x1e9   : > { %s1448_s18 = smov %s1141_s21  ;;  %16 = sbr.rel (!%p14_p3) target bundleno = 3 (0x3), region = 71 }
 0x1f0   :  { %768 = vsyncpa [#allocation3], 1 }
 0x1f1   :  { %770 = vsyncpa [#allocation3 + $0x1], 1 }

</bundles_post_ra>
